<compile_context>
chip_gen: v7x
topology: tpu7x:2x2x1
jax: 0.10.0
libtpu: 0.0.40
codegen_flags: <defaults>
</compile_context>

<pallas_src>
import math
import jax
import jax.numpy as jnp
from jax.experimental import pallas as pl
from jax.experimental.pallas import tpu as pltpu

# ---- model hyper-parameters (small, consistent with the module) ----
D_MODEL = 32
NUM_HEADS = 4
D_FF = 64
D_K = D_MODEL // NUM_HEADS
LN_EPS = 1e-5            # nn.LayerNorm default
NEG_INF = -1.0e9         # masked_fill value in the reference
APPROX_RECIPROCAL = True  # set False for an exact softmax denominator


def encoder_block_kernel(x_ref, bias_ref,
                         wq_ref, bq_ref, wk_ref, bk_ref, wv_ref, bv_ref,
                         wo_ref, bo_ref, w1_ref, b1_ref, w2_ref, b2_ref,
                         g1_ref, be1_ref, g2_ref, be2_ref,
                         o_ref):
    """One grid step == one batch element: x_ref is the (S, D) activation slab."""
    x = x_ref[...]                                    # (S, D) f32
    S, D = x.shape
    H = NUM_HEADS

    # ---- head-batched Q/K/V projections (weights carry the head axis) ----
    # 1/sqrt(D_K) is pre-folded into wq/bq in the wrapper.  Hoisted broadcast.
    xh = jnp.broadcast_to(x[None, :, :], (H, S, D))   # (H, S, D)
    q = jnp.einsum('hsd,hde->hse', xh, wq_ref[...],
                   preferred_element_type=jnp.float32) + bq_ref[...]   # (H,S,Dk)
    k = jnp.einsum('hsd,hde->hse', xh, wk_ref[...],
                   preferred_element_type=jnp.float32) + bk_ref[...]
    v = jnp.einsum('hsd,hde->hse', xh, wv_ref[...],
                   preferred_element_type=jnp.float32) + bv_ref[...]

    # ---- all heads at once: one batched einsum pair + one softmax pass ----
    scores = jnp.einsum('hqd,hkd->hqk', q, k,
                        preferred_element_type=jnp.float32)            # (H,S,S)
    scores = scores + bias_ref[...][None, :, :]       # additive mask bias
    scores = scores - jnp.max(scores, axis=-1, keepdims=True)
    p = jnp.exp(scores)
    p = p * pl.reciprocal(jnp.sum(p, axis=-1, keepdims=True),
                          approx=APPROX_RECIPROCAL)
    ctx = jnp.einsum('hqk,hkd->hqd', p, v,
                     preferred_element_type=jnp.float32)               # (H,S,Dk)

    # ---- output projection: head concat folded into per-head W_o matmuls ----
    attn = jnp.sum(jnp.einsum('hqd,hde->hqe', ctx, wo_ref[...],
                              preferred_element_type=jnp.float32),
                   axis=0) + bo_ref[0]                                 # (S, D)

    # dropout == identity in eval mode
    def layernorm(inp, g_ref, b_ref):
        mu = jnp.mean(inp, axis=-1, keepdims=True)
        var = jnp.mean((inp - mu) ** 2, axis=-1, keepdims=True)
        return (inp - mu) * jax.lax.rsqrt(var + LN_EPS) * g_ref[0] + b_ref[0]

    h1 = layernorm(x + attn, g1_ref, be1_ref)

    # ---- position-wise feed forward ----
    ff = jnp.maximum(
        jnp.dot(h1, w1_ref[...], preferred_element_type=jnp.float32) + b1_ref[0],
        0.0)
    ff = jnp.dot(ff, w2_ref[...], preferred_element_type=jnp.float32) + b2_ref[0]

    o_ref[...] = layernorm(h1 + ff, g2_ref, be2_ref).astype(o_ref.dtype)


def encoder_block(x, mask, params):
    """x: (B, S, D) f32, mask: (B, S, S) f32 (0 == masked). Returns (B, S, D)."""
    B, S, D = x.shape
    assert D == D_MODEL and D_MODEL % NUM_HEADS == 0
    scale = 1.0 / math.sqrt(D_K)

    # Per-head weight views + scale folding built once in the wrapper (XLA-side).
    wq_h = params["wq"].reshape(D, NUM_HEADS, D_K).transpose(1, 0, 2) * scale  # (H,D,Dk)
    wk_h = params["wk"].reshape(D, NUM_HEADS, D_K).transpose(1, 0, 2)
    wv_h = params["wv"].reshape(D, NUM_HEADS, D_K).transpose(1, 0, 2)
    bq_h = params["bq"].reshape(NUM_HEADS, 1, D_K) * scale                     # (H,1,Dk)
    bk_h = params["bk"].reshape(NUM_HEADS, 1, D_K)
    bv_h = params["bv"].reshape(NUM_HEADS, 1, D_K)
    wo_h = params["wo"].reshape(NUM_HEADS, D_K, D)                             # (H,Dk,D)

    # Additive attention bias per batch (masked_fill(mask==0, -1e9) equivalent).
    attn_bias = jnp.where(mask != 0.0, 0.0, NEG_INF).astype(jnp.float32)       # (B,S,S)

    args = [x, attn_bias,
            wq_h, bq_h, wk_h, bk_h, wv_h, bv_h,
            wo_h, params["bo"],
            params["w1"], params["b1"], params["w2"], params["b2"],
            params["g1"], params["be1"], params["g2"], params["be2"]]

    def resident(shape):
        # Constant block index => fetched once, stays VMEM-resident across steps.
        nd = len(shape)
        return pl.BlockSpec(tuple(shape), lambda b: (0,) * nd)

    in_specs = [
        pl.BlockSpec((None, S, D), lambda b: (b, 0, 0)),   # x: rotates per batch
        pl.BlockSpec((None, S, S), lambda b: (b, 0, 0)),   # mask bias: rotates
    ] + [resident(a.shape) for a in args[2:]]              # weights: resident

    out_specs = pl.BlockSpec((None, S, D), lambda b: (b, 0, 0))

    out = pl.pallas_call(
        encoder_block_kernel,
        grid=(B,),
        in_specs=in_specs,
        out_specs=out_specs,
        out_shape=jax.ShapeDtypeStruct((B, S, D), jnp.float32),
        compiler_params=pltpu.CompilerParams(
            dimension_semantics=("parallel",),          # shard batch across TCs (v7x)
            vmem_limit_bytes=32 * 1024 * 1024),         # explicit, generous headroom
    )(*args)
    return out


# ---------------- deterministic parameter init (mirrors __init__) -----------
def xavier_uniform(key, fan_in, fan_out):
    bound = math.sqrt(6.0 / (fan_in + fan_out))
    # stored as (in, out) so the kernel does x @ W
    return jax.random.uniform(key, (fan_in, fan_out), jnp.float32, -bound, bound)


def init_params(key):
    ks = jax.random.split(key, 6)
    return {
        "wq": xavier_uniform(ks[0], D_MODEL, D_MODEL),
        "wk": xavier_uniform(ks[1], D_MODEL, D_MODEL),
        "wv": xavier_uniform(ks[2], D_MODEL, D_MODEL),
        "wo": xavier_uniform(ks[3], D_MODEL, D_MODEL),
        "w1": xavier_uniform(ks[4], D_MODEL, D_FF),
        "w2": xavier_uniform(ks[5], D_FF, D_MODEL),
        "bq": jnp.zeros((1, D_MODEL), jnp.float32),
        "bk": jnp.zeros((1, D_MODEL), jnp.float32),
        "bv": jnp.zeros((1, D_MODEL), jnp.float32),
        "bo": jnp.zeros((1, D_MODEL), jnp.float32),
        "b1": jnp.zeros((1, D_FF), jnp.float32),
        "b2": jnp.zeros((1, D_MODEL), jnp.float32),
        "g1": jnp.ones((1, D_MODEL), jnp.float32),
        "be1": jnp.zeros((1, D_MODEL), jnp.float32),
        "g2": jnp.ones((1, D_MODEL), jnp.float32),
        "be2": jnp.zeros((1, D_MODEL), jnp.float32),
    }


# ---------------- pure-JAX reference for a correctness check ----------------
def reference_forward(x, mask, p):
    def lin(a, w, b):
        return a @ w + b[0]

    q = lin(x, p["wq"], p["bq"])
    k = lin(x, p["wk"], p["bk"])
    v = lin(x, p["wv"], p["bv"])
    B, S, D = x.shape

    def split(a):  # (B,S,D) -> (B,H,S,dk)
        return a.reshape(B, S, NUM_HEADS, D_K).transpose(0, 2, 1, 3)

    qh, kh, vh = split(q), split(k), split(v)
    scores = jnp.einsum("bhqd,bhkd->bhqk", qh, kh) / math.sqrt(D_K)
    scores = jnp.where(mask[:, None, :, :] == 0.0, NEG_INF, scores)
    w = jax.nn.softmax(scores, axis=-1)
    attn = jnp.einsum("bhqk,bhkd->bhqd", w, vh)
    attn = attn.transpose(0, 2, 1, 3).reshape(B, S, D)
    attn = lin(attn, p["wo"], p["bo"])

    def ln(a, g, b):
        mu = a.mean(-1, keepdims=True)
        var = ((a - mu) ** 2).mean(-1, keepdims=True)
        return (a - mu) * jax.lax.rsqrt(var + LN_EPS) * g[0] + b[0]

    h1 = ln(x + attn, p["g1"], p["be1"])
    ff = lin(jnp.maximum(lin(h1, p["w1"], p["b1"]), 0.0), p["w2"], p["b2"])
    return ln(h1 + ff, p["g2"], p["be2"])


if __name__ == "__main__":
    key = jax.random.PRNGKey(0)
    k_x, k_p = jax.random.split(key)

    B, S = 2, 8
    x = jax.random.normal(k_x, (B, S, D_MODEL), jnp.float32)
    params = init_params(k_p)

    # case 1: no positions masked
    mask = jnp.ones((B, S, S), jnp.float32)
    out = jax.block_until_ready(encoder_block(x, mask, params))
    ref = reference_forward(x, mask, params)
    assert out.shape == (B, S, D_MODEL)
    assert jnp.allclose(out, ref, atol=5e-3, rtol=5e-3), "mismatch vs reference"

    # case 2: padding-style mask (batch 1 ignores the last two key positions)
    mask2 = jnp.ones((B, S, S), jnp.float32).at[1, :, 6:].set(0.0)
    out2 = jax.block_until_ready(encoder_block(x, mask2, params))
    ref2 = reference_forward(x, mask2, params)
    assert jnp.allclose(out2, ref2, atol=5e-3, rtol=5e-3), "mismatch vs reference (masked)"

    print("KERNEL_OK")
</pallas_src>

<mosaic_0001>
module attributes {stable_mosaic.version = 11 : i64} {
  func.func @encoder_block_kernel(%arg0: i32, %arg1: memref<1x8x32xf32, #tpu.memory_space<vmem>>, %arg2: memref<1x8x8xf32, #tpu.memory_space<vmem>>, %arg3: memref<4x32x8xf32, #tpu.memory_space<vmem>>, %arg4: memref<4x1x8xf32, #tpu.memory_space<vmem>>, %arg5: memref<4x32x8xf32, #tpu.memory_space<vmem>>, %arg6: memref<4x1x8xf32, #tpu.memory_space<vmem>>, %arg7: memref<4x32x8xf32, #tpu.memory_space<vmem>>, %arg8: memref<4x1x8xf32, #tpu.memory_space<vmem>>, %arg9: memref<4x8x32xf32, #tpu.memory_space<vmem>>, %arg10: memref<1x32xf32, #tpu.memory_space<vmem>>, %arg11: memref<32x64xf32, #tpu.memory_space<vmem>>, %arg12: memref<1x64xf32, #tpu.memory_space<vmem>>, %arg13: memref<64x32xf32, #tpu.memory_space<vmem>>, %arg14: memref<1x32xf32, #tpu.memory_space<vmem>>, %arg15: memref<1x32xf32, #tpu.memory_space<vmem>>, %arg16: memref<1x32xf32, #tpu.memory_space<vmem>>, %arg17: memref<1x32xf32, #tpu.memory_space<vmem>>, %arg18: memref<1x32xf32, #tpu.memory_space<vmem>>, %arg19: memref<1x8x32xf32, #tpu.memory_space<vmem>>) attributes {dimension_semantics = [#tpu.dimension_semantics<parallel>], iteration_bounds = array<i64: 2>, scalar_prefetch = 0 : i64, scratch_operands = 0 : i64, tpu.core_type = #tpu.core_type<tc>, window_params = [{transform_indices = @transform_0, window_bounds = array<i64: 1, 8, 32>}, {transform_indices = @transform_1, window_bounds = array<i64: 1, 8, 8>}, {pipeline_mode = #tpu.pipeline_mode<synchronous>, transform_indices = @transform_2, window_bounds = array<i64: 4, 32, 8>}, {pipeline_mode = #tpu.pipeline_mode<synchronous>, transform_indices = @transform_3, window_bounds = array<i64: 4, 1, 8>}, {pipeline_mode = #tpu.pipeline_mode<synchronous>, transform_indices = @transform_4, window_bounds = array<i64: 4, 32, 8>}, {pipeline_mode = #tpu.pipeline_mode<synchronous>, transform_indices = @transform_5, window_bounds = array<i64: 4, 1, 8>}, {pipeline_mode = #tpu.pipeline_mode<synchronous>, transform_indices = @transform_6, window_bounds = array<i64: 4, 32, 8>}, {pipeline_mode = #tpu.pipeline_mode<synchronous>, transform_indices = @transform_7, window_bounds = array<i64: 4, 1, 8>}, {pipeline_mode = #tpu.pipeline_mode<synchronous>, transform_indices = @transform_8, window_bounds = array<i64: 4, 8, 32>}, {pipeline_mode = #tpu.pipeline_mode<synchronous>, transform_indices = @transform_9, window_bounds = array<i64: 1, 32>}, {pipeline_mode = #tpu.pipeline_mode<synchronous>, transform_indices = @transform_10, window_bounds = array<i64: 32, 64>}, {pipeline_mode = #tpu.pipeline_mode<synchronous>, transform_indices = @transform_11, window_bounds = array<i64: 1, 64>}, {pipeline_mode = #tpu.pipeline_mode<synchronous>, transform_indices = @transform_12, window_bounds = array<i64: 64, 32>}, {pipeline_mode = #tpu.pipeline_mode<synchronous>, transform_indices = @transform_13, window_bounds = array<i64: 1, 32>}, {pipeline_mode = #tpu.pipeline_mode<synchronous>, transform_indices = @transform_14, window_bounds = array<i64: 1, 32>}, {pipeline_mode = #tpu.pipeline_mode<synchronous>, transform_indices = @transform_15, window_bounds = array<i64: 1, 32>}, {pipeline_mode = #tpu.pipeline_mode<synchronous>, transform_indices = @transform_16, window_bounds = array<i64: 1, 32>}, {pipeline_mode = #tpu.pipeline_mode<synchronous>, transform_indices = @transform_17, window_bounds = array<i64: 1, 32>}, {transform_indices = @transform_18, window_bounds = array<i64: 1, 8, 32>}]} {
    %c0 = arith.constant 0 : index
    %c0_0 = arith.constant 0 : index
    %c0_1 = arith.constant 0 : index
    %0 = vector.load %arg1[%c0, %c0_0, %c0_1] : memref<1x8x32xf32, #tpu.memory_space<vmem>>, vector<1x8x32xf32>
    %1 = vector.shape_cast %0 : vector<1x8x32xf32> to vector<8x32xf32>
    %2 = vector.shape_cast %1 : vector<8x32xf32> to vector<1x8x32xf32>
    %3 = vector.shape_cast %2 : vector<1x8x32xf32> to vector<1x8x32xf32>
    %4 = vector.broadcast %3 : vector<1x8x32xf32> to vector<4x8x32xf32>
    %c0_2 = arith.constant 0 : index
    %c0_3 = arith.constant 0 : index
    %c0_4 = arith.constant 0 : index
    %5 = vector.load %arg3[%c0_2, %c0_3, %c0_4] : memref<4x32x8xf32, #tpu.memory_space<vmem>>, vector<4x32x8xf32>
    "tpu.trace_start"() <{level = 10 : i32, message = "hsd,hde->hse"}> : () -> ()
    %cst = arith.constant dense<0.000000e+00> : vector<4x8x8xf32>
    %6 = tpu.matmul %4, %5, %cst {dimension_numbers = #tpu.dot_dimension_numbers<[2], [1], [1], [2], [0, 0, 0, 1, 1, 2], [0], [0]>} : vector<4x8x32xf32>, vector<4x32x8xf32>, vector<4x8x8xf32> -> vector<4x8x8xf32>
    "tpu.trace_stop"() : () -> ()
    %c0_5 = arith.constant 0 : index
    %c0_6 = arith.constant 0 : index
    %c0_7 = arith.constant 0 : index
    %7 = vector.load %arg4[%c0_5, %c0_6, %c0_7] : memref<4x1x8xf32, #tpu.memory_space<vmem>>, vector<4x1x8xf32>
    %8 = vector.broadcast %7 : vector<4x1x8xf32> to vector<4x8x8xf32>
    %9 = arith.addf %6, %8 : vector<4x8x8xf32>
    %c0_8 = arith.constant 0 : index
    %c0_9 = arith.constant 0 : index
    %c0_10 = arith.constant 0 : index
    %10 = vector.load %arg5[%c0_8, %c0_9, %c0_10] : memref<4x32x8xf32, #tpu.memory_space<vmem>>, vector<4x32x8xf32>
    "tpu.trace_start"() <{level = 10 : i32, message = "hsd,hde->hse"}> : () -> ()
    %cst_11 = arith.constant dense<0.000000e+00> : vector<4x8x8xf32>
    %11 = tpu.matmul %4, %10, %cst_11 {dimension_numbers = #tpu.dot_dimension_numbers<[2], [1], [1], [2], [0, 0, 0, 1, 1, 2], [0], [0]>} : vector<4x8x32xf32>, vector<4x32x8xf32>, vector<4x8x8xf32> -> vector<4x8x8xf32>
    "tpu.trace_stop"() : () -> ()
    %c0_12 = arith.constant 0 : index
    %c0_13 = arith.constant 0 : index
    %c0_14 = arith.constant 0 : index
    %12 = vector.load %arg6[%c0_12, %c0_13, %c0_14] : memref<4x1x8xf32, #tpu.memory_space<vmem>>, vector<4x1x8xf32>
    %13 = vector.broadcast %12 : vector<4x1x8xf32> to vector<4x8x8xf32>
    %14 = arith.addf %11, %13 : vector<4x8x8xf32>
    %c0_15 = arith.constant 0 : index
    %c0_16 = arith.constant 0 : index
    %c0_17 = arith.constant 0 : index
    %15 = vector.load %arg7[%c0_15, %c0_16, %c0_17] : memref<4x32x8xf32, #tpu.memory_space<vmem>>, vector<4x32x8xf32>
    "tpu.trace_start"() <{level = 10 : i32, message = "hsd,hde->hse"}> : () -> ()
    %cst_18 = arith.constant dense<0.000000e+00> : vector<4x8x8xf32>
    %16 = tpu.matmul %4, %15, %cst_18 {dimension_numbers = #tpu.dot_dimension_numbers<[2], [1], [1], [2], [0, 0, 0, 1, 1, 2], [0], [0]>} : vector<4x8x32xf32>, vector<4x32x8xf32>, vector<4x8x8xf32> -> vector<4x8x8xf32>
    "tpu.trace_stop"() : () -> ()
    %c0_19 = arith.constant 0 : index
    %c0_20 = arith.constant 0 : index
    %c0_21 = arith.constant 0 : index
    %17 = vector.load %arg8[%c0_19, %c0_20, %c0_21] : memref<4x1x8xf32, #tpu.memory_space<vmem>>, vector<4x1x8xf32>
    %18 = vector.broadcast %17 : vector<4x1x8xf32> to vector<4x8x8xf32>
    %19 = arith.addf %16, %18 : vector<4x8x8xf32>
    "tpu.trace_start"() <{level = 10 : i32, message = "hqd,hkd->hqk"}> : () -> ()
    %cst_22 = arith.constant dense<0.000000e+00> : vector<4x8x8xf32>
    %20 = tpu.matmul %9, %14, %cst_22 {dimension_numbers = #tpu.dot_dimension_numbers<[2], [2], [1], [1], [0, 0, 0, 1, 1, 1], [0], [0]>} : vector<4x8x8xf32>, vector<4x8x8xf32>, vector<4x8x8xf32> -> vector<4x8x8xf32>
    "tpu.trace_stop"() : () -> ()
    %c0_23 = arith.constant 0 : index
    %c0_24 = arith.constant 0 : index
    %c0_25 = arith.constant 0 : index
    %21 = vector.load %arg2[%c0_23, %c0_24, %c0_25] : memref<1x8x8xf32, #tpu.memory_space<vmem>>, vector<1x8x8xf32>
    %22 = vector.shape_cast %21 : vector<1x8x8xf32> to vector<8x8xf32>
    %23 = vector.shape_cast %22 : vector<8x8xf32> to vector<1x8x8xf32>
    %24 = vector.broadcast %23 : vector<1x8x8xf32> to vector<4x8x8xf32>
    %25 = arith.addf %20, %24 : vector<4x8x8xf32>
    %cst_26 = arith.constant dense<0xFF800000> : vector<4x8xf32>
    %26 = vector.multi_reduction <maximumf>, %25, %cst_26 [2] : vector<4x8x8xf32> to vector<4x8xf32>
    %27 = vector.shape_cast %26 : vector<4x8xf32> to vector<4x8x1xf32>
    %28 = vector.broadcast %27 : vector<4x8x1xf32> to vector<4x8x8xf32>
    %29 = arith.subf %25, %28 : vector<4x8x8xf32>
    %30 = math.exp %29 : vector<4x8x8xf32>
    %cst_27 = arith.constant dense<0.000000e+00> : vector<4x8xf32>
    %31 = vector.multi_reduction <add>, %30, %cst_27 [2] : vector<4x8x8xf32> to vector<4x8xf32>
    %32 = vector.shape_cast %31 : vector<4x8xf32> to vector<4x8x1xf32>
    %33 = tpu.reciprocal %32 {approx = true} : vector<4x8x1xf32> -> vector<4x8x1xf32>
    %34 = vector.broadcast %33 : vector<4x8x1xf32> to vector<4x8x8xf32>
    %35 = arith.mulf %30, %34 : vector<4x8x8xf32>
    "tpu.trace_start"() <{level = 10 : i32, message = "hqk,hkd->hqd"}> : () -> ()
    %cst_28 = arith.constant dense<0.000000e+00> : vector<4x8x8xf32>
    %36 = tpu.matmul %35, %19, %cst_28 {dimension_numbers = #tpu.dot_dimension_numbers<[2], [1], [1], [2], [0, 0, 0, 1, 1, 2], [0], [0]>} : vector<4x8x8xf32>, vector<4x8x8xf32>, vector<4x8x8xf32> -> vector<4x8x8xf32>
    "tpu.trace_stop"() : () -> ()
    %c0_29 = arith.constant 0 : index
    %c0_30 = arith.constant 0 : index
    %c0_31 = arith.constant 0 : index
    %37 = vector.load %arg9[%c0_29, %c0_30, %c0_31] : memref<4x8x32xf32, #tpu.memory_space<vmem>>, vector<4x8x32xf32>
    "tpu.trace_start"() <{level = 10 : i32, message = "hqd,hde->hqe"}> : () -> ()
    %cst_32 = arith.constant dense<0.000000e+00> : vector<4x8x32xf32>
    %38 = tpu.matmul %36, %37, %cst_32 {dimension_numbers = #tpu.dot_dimension_numbers<[2], [1], [1], [2], [0, 0, 0, 1, 1, 2], [0], [0]>} : vector<4x8x8xf32>, vector<4x8x32xf32>, vector<4x8x32xf32> -> vector<4x8x32xf32>
    "tpu.trace_stop"() : () -> ()
    %cst_33 = arith.constant dense<0.000000e+00> : vector<8x32xf32>
    %39 = vector.multi_reduction <add>, %38, %cst_33 [0] : vector<4x8x32xf32> to vector<8x32xf32>
    %c0_34 = arith.constant 0 : index
    %c0_35 = arith.constant 0 : index
    %40 = vector.load %arg10[%c0_34, %c0_35] : memref<1x32xf32, #tpu.memory_space<vmem>>, vector<1x32xf32>
    %41 = vector.shape_cast %40 : vector<1x32xf32> to vector<32xf32>
    %42 = vector.shape_cast %41 : vector<32xf32> to vector<1x32xf32>
    %43 = vector.broadcast %42 : vector<1x32xf32> to vector<8x32xf32>
    %44 = arith.addf %39, %43 : vector<8x32xf32>
    %45 = arith.addf %1, %44 : vector<8x32xf32>
    %cst_36 = arith.constant dense<0.000000e+00> : vector<8xf32>
    %46 = vector.multi_reduction <add>, %45, %cst_36 [1] : vector<8x32xf32> to vector<8xf32>
    %47 = vector.shape_cast %46 : vector<8xf32> to vector<8x1xf32>
    %cst_37 = arith.constant 3.200000e+01 : f32
    %48 = vector.broadcast %cst_37 : f32 to vector<8x1xf32>
    %49 = arith.divf %47, %48 : vector<8x1xf32>
    %50 = vector.broadcast %49 : vector<8x1xf32> to vector<8x32xf32>
    %51 = arith.subf %45, %50 : vector<8x32xf32>
    %52 = arith.mulf %51, %51 : vector<8x32xf32>
    %cst_38 = arith.constant dense<0.000000e+00> : vector<8xf32>
    %53 = vector.multi_reduction <add>, %52, %cst_38 [1] : vector<8x32xf32> to vector<8xf32>
    %54 = vector.shape_cast %53 : vector<8xf32> to vector<8x1xf32>
    %cst_39 = arith.constant 3.200000e+01 : f32
    %55 = vector.broadcast %cst_39 : f32 to vector<8x1xf32>
    %56 = arith.divf %54, %55 : vector<8x1xf32>
    %57 = vector.broadcast %49 : vector<8x1xf32> to vector<8x32xf32>
    %58 = arith.subf %45, %57 : vector<8x32xf32>
    %cst_40 = arith.constant 9.99999974E-6 : f32
    %59 = vector.broadcast %cst_40 : f32 to vector<8x1xf32>
    %60 = arith.addf %56, %59 : vector<8x1xf32>
    %61 = math.rsqrt %60 : vector<8x1xf32>
    %62 = vector.broadcast %61 : vector<8x1xf32> to vector<8x32xf32>
    %63 = arith.mulf %58, %62 : vector<8x32xf32>
    %c0_41 = arith.constant 0 : index
    %c0_42 = arith.constant 0 : index
    %64 = vector.load %arg15[%c0_41, %c0_42] : memref<1x32xf32, #tpu.memory_space<vmem>>, vector<1x32xf32>
    %65 = vector.shape_cast %64 : vector<1x32xf32> to vector<32xf32>
    %66 = vector.shape_cast %65 : vector<32xf32> to vector<1x32xf32>
    %67 = vector.broadcast %66 : vector<1x32xf32> to vector<8x32xf32>
    %68 = arith.mulf %63, %67 : vector<8x32xf32>
    %c0_43 = arith.constant 0 : index
    %c0_44 = arith.constant 0 : index
    %69 = vector.load %arg16[%c0_43, %c0_44] : memref<1x32xf32, #tpu.memory_space<vmem>>, vector<1x32xf32>
    %70 = vector.shape_cast %69 : vector<1x32xf32> to vector<32xf32>
    %71 = vector.shape_cast %70 : vector<32xf32> to vector<1x32xf32>
    %72 = vector.broadcast %71 : vector<1x32xf32> to vector<8x32xf32>
    %73 = arith.addf %68, %72 : vector<8x32xf32>
    %c0_45 = arith.constant 0 : index
    %c0_46 = arith.constant 0 : index
    %74 = vector.load %arg11[%c0_45, %c0_46] : memref<32x64xf32, #tpu.memory_space<vmem>>, vector<32x64xf32>
    %cst_47 = arith.constant dense<0.000000e+00> : vector<8x64xf32>
    %75 = tpu.matmul %73, %74, %cst_47 {dimension_numbers = #tpu.dot_dimension_numbers<[1], [0], [0], [1], [0, 0, 1, 1], [], []>} : vector<8x32xf32>, vector<32x64xf32>, vector<8x64xf32> -> vector<8x64xf32>
    %c0_48 = arith.constant 0 : index
    %c0_49 = arith.constant 0 : index
    %76 = vector.load %arg12[%c0_48, %c0_49] : memref<1x64xf32, #tpu.memory_space<vmem>>, vector<1x64xf32>
    %77 = vector.shape_cast %76 : vector<1x64xf32> to vector<64xf32>
    %78 = vector.shape_cast %77 : vector<64xf32> to vector<1x64xf32>
    %79 = vector.broadcast %78 : vector<1x64xf32> to vector<8x64xf32>
    %80 = arith.addf %75, %79 : vector<8x64xf32>
    %cst_50 = arith.constant 0.000000e+00 : f32
    %81 = vector.broadcast %cst_50 : f32 to vector<8x64xf32>
    %82 = arith.maximumf %80, %81 : vector<8x64xf32>
    %c0_51 = arith.constant 0 : index
    %c0_52 = arith.constant 0 : index
    %83 = vector.load %arg13[%c0_51, %c0_52] : memref<64x32xf32, #tpu.memory_space<vmem>>, vector<64x32xf32>
    %cst_53 = arith.constant dense<0.000000e+00> : vector<8x32xf32>
    %84 = tpu.matmul %82, %83, %cst_53 {dimension_numbers = #tpu.dot_dimension_numbers<[1], [0], [0], [1], [0, 0, 1, 1], [], []>} : vector<8x64xf32>, vector<64x32xf32>, vector<8x32xf32> -> vector<8x32xf32>
    %c0_54 = arith.constant 0 : index
    %c0_55 = arith.constant 0 : index
    %85 = vector.load %arg14[%c0_54, %c0_55] : memref<1x32xf32, #tpu.memory_space<vmem>>, vector<1x32xf32>
    %86 = vector.shape_cast %85 : vector<1x32xf32> to vector<32xf32>
    %87 = vector.shape_cast %86 : vector<32xf32> to vector<1x32xf32>
    %88 = vector.broadcast %87 : vector<1x32xf32> to vector<8x32xf32>
    %89 = arith.addf %84, %88 : vector<8x32xf32>
    %90 = arith.addf %73, %89 : vector<8x32xf32>
    %cst_56 = arith.constant dense<0.000000e+00> : vector<8xf32>
    %91 = vector.multi_reduction <add>, %90, %cst_56 [1] : vector<8x32xf32> to vector<8xf32>
    %92 = vector.shape_cast %91 : vector<8xf32> to vector<8x1xf32>
    %cst_57 = arith.constant 3.200000e+01 : f32
    %93 = vector.broadcast %cst_57 : f32 to vector<8x1xf32>
    %94 = arith.divf %92, %93 : vector<8x1xf32>
    %95 = vector.broadcast %94 : vector<8x1xf32> to vector<8x32xf32>
    %96 = arith.subf %90, %95 : vector<8x32xf32>
    %97 = arith.mulf %96, %96 : vector<8x32xf32>
    %cst_58 = arith.constant dense<0.000000e+00> : vector<8xf32>
    %98 = vector.multi_reduction <add>, %97, %cst_58 [1] : vector<8x32xf32> to vector<8xf32>
    %99 = vector.shape_cast %98 : vector<8xf32> to vector<8x1xf32>
    %cst_59 = arith.constant 3.200000e+01 : f32
    %100 = vector.broadcast %cst_59 : f32 to vector<8x1xf32>
    %101 = arith.divf %99, %100 : vector<8x1xf32>
    %102 = vector.broadcast %94 : vector<8x1xf32> to vector<8x32xf32>
    %103 = arith.subf %90, %102 : vector<8x32xf32>
    %cst_60 = arith.constant 9.99999974E-6 : f32
    %104 = vector.broadcast %cst_60 : f32 to vector<8x1xf32>
    %105 = arith.addf %101, %104 : vector<8x1xf32>
    %106 = math.rsqrt %105 : vector<8x1xf32>
    %107 = vector.broadcast %106 : vector<8x1xf32> to vector<8x32xf32>
    %108 = arith.mulf %103, %107 : vector<8x32xf32>
    %c0_61 = arith.constant 0 : index
    %c0_62 = arith.constant 0 : index
    %109 = vector.load %arg17[%c0_61, %c0_62] : memref<1x32xf32, #tpu.memory_space<vmem>>, vector<1x32xf32>
    %110 = vector.shape_cast %109 : vector<1x32xf32> to vector<32xf32>
    %111 = vector.shape_cast %110 : vector<32xf32> to vector<1x32xf32>
    %112 = vector.broadcast %111 : vector<1x32xf32> to vector<8x32xf32>
    %113 = arith.mulf %108, %112 : vector<8x32xf32>
    %c0_63 = arith.constant 0 : index
    %c0_64 = arith.constant 0 : index
    %114 = vector.load %arg18[%c0_63, %c0_64] : memref<1x32xf32, #tpu.memory_space<vmem>>, vector<1x32xf32>
    %115 = vector.shape_cast %114 : vector<1x32xf32> to vector<32xf32>
    %116 = vector.shape_cast %115 : vector<32xf32> to vector<1x32xf32>
    %117 = vector.broadcast %116 : vector<1x32xf32> to vector<8x32xf32>
    %118 = arith.addf %113, %117 : vector<8x32xf32>
    %c0_65 = arith.constant 0 : index
    %c0_66 = arith.constant 0 : index
    %c0_67 = arith.constant 0 : index
    %119 = vector.load %arg19[%c0_65, %c0_66, %c0_67] : memref<1x8x32xf32, #tpu.memory_space<vmem>>, vector<1x8x32xf32>
    %120 = vector.shape_cast %119 : vector<1x8x32xf32> to vector<8x32xf32>
    %121 = vector.shape_cast %118 : vector<8x32xf32> to vector<1x8x32xf32>
    tpu.vector_store %arg19[%c0_65, %c0_66, %c0_67], %121 {strides = array<i32>} : memref<1x8x32xf32, #tpu.memory_space<vmem>>, vector<1x8x32xf32>,
    return
  }
  func.func @transform_0(%arg0: i32) -> (i32, i32, i32) {
    %c0_i32 = arith.constant 0 : i32
    %c0_i32_0 = arith.constant 0 : i32
    %c0_i32_1 = arith.constant 0 : i32
    return %arg0, %c0_i32, %c0_i32_0 : i32, i32, i32
  }
  func.func @transform_1(%arg0: i32) -> (i32, i32, i32) {
    %c0_i32 = arith.constant 0 : i32
    %c0_i32_0 = arith.constant 0 : i32
    %c0_i32_1 = arith.constant 0 : i32
    return %arg0, %c0_i32, %c0_i32_0 : i32, i32, i32
  }
  func.func @transform_2(%arg0: i32) -> (i32, i32, i32) {
    %c0_i32 = arith.constant 0 : i32
    %c0_i32_0 = arith.constant 0 : i32
    %c0_i32_1 = arith.constant 0 : i32
    %c0_i32_2 = arith.constant 0 : i32
    return %c0_i32, %c0_i32_0, %c0_i32_1 : i32, i32, i32
  }
  func.func @transform_3(%arg0: i32) -> (i32, i32, i32) {
    %c0_i32 = arith.constant 0 : i32
    %c0_i32_0 = arith.constant 0 : i32
    %c0_i32_1 = arith.constant 0 : i32
    %c0_i32_2 = arith.constant 0 : i32
    return %c0_i32, %c0_i32_0, %c0_i32_1 : i32, i32, i32
  }
  func.func @transform_4(%arg0: i32) -> (i32, i32, i32) {
    %c0_i32 = arith.constant 0 : i32
    %c0_i32_0 = arith.constant 0 : i32
    %c0_i32_1 = arith.constant 0 : i32
    %c0_i32_2 = arith.constant 0 : i32
    return %c0_i32, %c0_i32_0, %c0_i32_1 : i32, i32, i32
  }
  func.func @transform_5(%arg0: i32) -> (i32, i32, i32) {
    %c0_i32 = arith.constant 0 : i32
    %c0_i32_0 = arith.constant 0 : i32
    %c0_i32_1 = arith.constant 0 : i32
    %c0_i32_2 = arith.constant 0 : i32
    return %c0_i32, %c0_i32_0, %c0_i32_1 : i32, i32, i32
  }
  func.func @transform_6(%arg0: i32) -> (i32, i32, i32) {
    %c0_i32 = arith.constant 0 : i32
    %c0_i32_0 = arith.constant 0 : i32
    %c0_i32_1 = arith.constant 0 : i32
    %c0_i32_2 = arith.constant 0 : i32
    return %c0_i32, %c0_i32_0, %c0_i32_1 : i32, i32, i32
  }
  func.func @transform_7(%arg0: i32) -> (i32, i32, i32) {
    %c0_i32 = arith.constant 0 : i32
    %c0_i32_0 = arith.constant 0 : i32
    %c0_i32_1 = arith.constant 0 : i32
    %c0_i32_2 = arith.constant 0 : i32
    return %c0_i32, %c0_i32_0, %c0_i32_1 : i32, i32, i32
  }
  func.func @transform_8(%arg0: i32) -> (i32, i32, i32) {
    %c0_i32 = arith.constant 0 : i32
    %c0_i32_0 = arith.constant 0 : i32
    %c0_i32_1 = arith.constant 0 : i32
    %c0_i32_2 = arith.constant 0 : i32
    return %c0_i32, %c0_i32_0, %c0_i32_1 : i32, i32, i32
  }
  func.func @transform_9(%arg0: i32) -> (i32, i32) {
    %c0_i32 = arith.constant 0 : i32
    %c0_i32_0 = arith.constant 0 : i32
    %c0_i32_1 = arith.constant 0 : i32
    return %c0_i32, %c0_i32_0 : i32, i32
  }
  func.func @transform_10(%arg0: i32) -> (i32, i32) {
    %c0_i32 = arith.constant 0 : i32
    %c0_i32_0 = arith.constant 0 : i32
    %c0_i32_1 = arith.constant 0 : i32
    return %c0_i32, %c0_i32_0 : i32, i32
  }
  func.func @transform_11(%arg0: i32) -> (i32, i32) {
    %c0_i32 = arith.constant 0 : i32
    %c0_i32_0 = arith.constant 0 : i32
    %c0_i32_1 = arith.constant 0 : i32
    return %c0_i32, %c0_i32_0 : i32, i32
  }
  func.func @transform_12(%arg0: i32) -> (i32, i32) {
    %c0_i32 = arith.constant 0 : i32
    %c0_i32_0 = arith.constant 0 : i32
    %c0_i32_1 = arith.constant 0 : i32
    return %c0_i32, %c0_i32_0 : i32, i32
  }
  func.func @transform_13(%arg0: i32) -> (i32, i32) {
    %c0_i32 = arith.constant 0 : i32
    %c0_i32_0 = arith.constant 0 : i32
    %c0_i32_1 = arith.constant 0 : i32
    return %c0_i32, %c0_i32_0 : i32, i32
  }
  func.func @transform_14(%arg0: i32) -> (i32, i32) {
    %c0_i32 = arith.constant 0 : i32
    %c0_i32_0 = arith.constant 0 : i32
    %c0_i32_1 = arith.constant 0 : i32
    return %c0_i32, %c0_i32_0 : i32, i32
  }
  func.func @transform_15(%arg0: i32) -> (i32, i32) {
    %c0_i32 = arith.constant 0 : i32
    %c0_i32_0 = arith.constant 0 : i32
    %c0_i32_1 = arith.constant 0 : i32
    return %c0_i32, %c0_i32_0 : i32, i32
  }
  func.func @transform_16(%arg0: i32) -> (i32, i32) {
    %c0_i32 = arith.constant 0 : i32
    %c0_i32_0 = arith.constant 0 : i32
    %c0_i32_1 = arith.constant 0 : i32
    return %c0_i32, %c0_i32_0 : i32, i32
  }
  func.func @transform_17(%arg0: i32) -> (i32, i32) {
    %c0_i32 = arith.constant 0 : i32
    %c0_i32_0 = arith.constant 0 : i32
    %c0_i32_1 = arith.constant 0 : i32
    return %c0_i32, %c0_i32_0 : i32, i32
  }
  func.func @transform_18(%arg0: i32) -> (i32, i32, i32) {
    %c0_i32 = arith.constant 0 : i32
    %c0_i32_0 = arith.constant 0 : i32
    %c0_i32_1 = arith.constant 0 : i32
    return %arg0, %c0_i32, %c0_i32_0 : i32, i32, i32
  }
}

</mosaic_0001>

<bundles_post_ra>
// kernel: tpu_custom_call.1
= control target key start
LH: loop header
LB: loop body
LE: loop exit
PB: predicated region body
PF: predicated region fallthrough
CT: control target
= control target key end

     0   :  { %s4054_s0 = inlined_call_operand.vmem [shape: f32[2,8,32], index: 0, kind: input, shape index: {}]   ;;  %s4055_s1 = inlined_call_operand.vmem [shape: f32[2,8,8], index: 1, kind: input, shape index: {}]   ;;  %s4056_s2 = inlined_call_operand.vmem [shape: f32[4,32,8], index: 2, kind: input, shape index: {}]   ;;  %s4057_s3 = inlined_call_operand.vmem [shape: f32[4,1,8], index: 3, kind: input, shape index: {}]   ;;  %s4058_s4 = inlined_call_operand.vmem [shape: f32[4,32,8], index: 4, kind: input, shape index: {}]   ;;  %s4059_s5 = inlined_call_operand.vmem [shape: f32[4,1,8], index: 5, kind: input, shape index: {}]   ;;  %s4060_s6 = inlined_call_operand.vmem [shape: f32[4,32,8], index: 6, kind: input, shape index: {}]   ;;  %s4061_s7 = inlined_call_operand.vmem [shape: f32[4,1,8], index: 7, kind: input, shape index: {}]   ;;  %s4062_s8 = inlined_call_operand.vmem [shape: f32[4,8,32], index: 8, kind: input, shape index: {}]   ;;  %s4063_s9 = inlined_call_operand.vmem [shape: f32[1,32], index: 9, kind: input, shape index: {}]   ;;  %s4064_s10 = inlined_call_operand.vmem [shape: f32[32,64], index: 10, kind: input, shape index: {}]   ;;  %s4065_s11 = inlined_call_operand.vmem [shape: f32[1,64], index: 11, kind: input, shape index: {}]   ;;  %s4066_s12 = inlined_call_operand.vmem [shape: f32[64,32], index: 12, kind: input, shape index: {}]   ;;  %s4067_s13 = inlined_call_operand.vmem [shape: f32[1,32], index: 13, kind: input, shape index: {}]   ;;  %s4068_s14 = inlined_call_operand.vmem [shape: f32[1,32], index: 14, kind: input, shape index: {}]   ;;  %s4069_s15 = inlined_call_operand.vmem [shape: f32[1,32], index: 15, kind: input, shape index: {}]   ;;  %s4070_s16 = inlined_call_operand.vmem [shape: f32[1,32], index: 16, kind: input, shape index: {}]   ;;  %s4071_s17 = inlined_call_operand.vmem [shape: f32[1,32], index: 17, kind: input, shape index: {}]   ;;  %s4072_s18 = inlined_call_operand.hbm [shape: f32[2,8,32], index: 18, kind: output, shape index: {}]  }
   0x1   :  { %4081 = sst [smem:[#allocation11_spill]] %s4054_s0 }
   0x2   :  { %4082 = sst [smem:[#allocation12_spill]] %s4055_s1 }
   0x3   :  { %4083 = sst [smem:[#allocation13_spill]] %s4056_s2 }
   0x4   :  { %4084 = sst [smem:[#allocation14_spill]] %s4057_s3 }
   0x5   :  { %4085 = sst [smem:[#allocation15_spill]] %s4072_s18 }
   0x6   :  { %23 = vsyncpa [#allocation3], 0 }
   0x7   :  { %25 = vsyncpa [#allocation3 + $0x1], 0  ;;  %s3534_s27 = smov 0   ;;  %s3536_s28 = smov 0  }
   0x8   :  { %s3538_s29 = smov 0   ;;  %s3540_s30 = smov 0  }
   0x9 LB: > { %4086 = sst [smem:[#allocation5_spill]] %s3421_s27  ;;  %s3555_s0 = sadd.s32 4294967295, %s3433_s30   ;;  %s3433_s30 = sphi %s3540_s30, %s4102_s30   ;;  %s3429_s29 = sphi %s3538_s29, %s4104_s29   ;;  %s3425_s28 = sphi %s3536_s28, %s4106_s28   ;;  %s3421_s27 = sphi %s3534_s27, %s4105_s27  }
   0xa   : > { %4087 = sst [smem:[#allocation6_spill]] %s3429_s29  ;;  %s2839_s19 = sadd.s32 4294967294, %s3433_s30  }
   0xb   : > { %4088 = sst [smem:[#allocation7_spill]] %s3433_s30  ;;  %s3559_s1 = sadd.s32 1, %s3433_s30  }
   0xc   : > { %4089 = sst [smem:[#allocation8_spill]] %s3559_s1  ;;  %s426_s20 = sadd.s32 1, %s3429_s29 }
   0xd   : > { %s423_s21 = ssub.s32 %s3433_s30, %s3559_s1  ;;  %p436_p0 = scmp.ne.s32.totalorder %s3429_s29, %s3425_s28 }
   0xe   : > { %p424_p1 = scmp.eq.s32.totalorder %s423_s21, 0  ;;  %p437_p2 = scmp.eq.s32.totalorder %s3555_s0, 1 }
   0xf   : > { %p442_p3 = scmp.ne.s32.totalorder %s3425_s28, %s3421_s27  ;;  %p443_p4 = scmp.eq.s32.totalorder %s2839_s19, 1 }
  0x10   : > { %s3570_s22 = scalar_select %p424_p1, %s3429_s29, %s426_s20  }
  0x11   : > { %p3572_p5 = por %p437_p2, %p436_p0  ;;  %p3576_p6 = por %p443_p4, %p442_p3 }
  0x12   : > { %4090 = sst [smem:[#allocation9_spill]] %s3570_s22  ;;  %p2842_p7 = scmp.ge.s32.totalorder %s3433_s30, 1 }
  0x13   : > { %s4092_s23 = scalar_select %p3576_p6, 1, 0 }
  0x14   : > { %p523_p8 = scmp.lt.s32.totalorder %s3433_s30, 3 }
  0x15   : > { %4093 = sst [smem:[#allocation10_spill]] %s4092_s23 }
  0x16   : > { %p524_p9 = pnand %p2842_p7, %p523_p8 }
  0x17   : > { %s4094_s26 = sld [smem:[#allocation13_spill]] (!%p524_p9)  ;;  %v3435_v3 = vmov (!%p524_p9), 0.0|0.0   ;;  %p580_p10 = scmp.lt.s32.totalorder (!%p524_p9), %s3555_s0, 1  ;;  %vm3436_vm0 = vmmov (!%p524_p9), 0   ;;  %v3437_v11 = vmov (!%p524_p9), 0.0   ;;  %vm633_vm1 = vcmask (!%p524_p9), 261120  }
  0x18   : > { %527 = sbr.rel (%p524_p9) target bundleno = 2315 (0x90b), region = 92  ;;  %3219 = vmatprep.subr.bf16.mxu0 (!%p524_p9), %v3435_v3  ;;  %3225 = vmatprep.subr.bf16.mxu1 (!%p524_p9), %v3435_v3  ;;  %s4095_s27 = sld [smem:[#allocation11_spill]] (!%p524_p9)  ;;  %v917_v27 = vld [vmem:[%s4058_s4] sm:$0xff] (!%p524_p9)  ;;  %v918_v28 = vld [vmem:[%s4058_s4 + $0x8] sm:$0xff] (!%p524_p9)  ;;  %v919_v33 = vld [vmem:[%s4058_s4 + $0x10] sm:$0xff] (!%p524_p9)  ;;  %vm1566_vm2 = vcmask (!%p524_p9), 64512  }
  0x19   : > { %3005 = vmatprep.mubr.msk.f32.mxu0 (!%p524_p9), %vm3436_vm0, %v3437_v11  ;;  %3016 = vmatprep.mubr.msk.f32.mxu1 (!%p524_p9), %vm3436_vm0, %v3437_v11  ;;  %v921_v29 = vld [vmem:[%s4058_s4 + $0x20] sm:$0xff] (!%p524_p9)  ;;  %v922_v30 = vld [vmem:[%s4058_s4 + $0x28] sm:$0xff] (!%p524_p9)  ;;  %v3244_v31 = vpack.c.bf16 (!%p524_p9), %v918_v28, %v917_v27  ;;  %v920_v34 = vld [vmem:[%s4058_s4 + $0x18] sm:$0xff] (!%p524_p9)  ;;  %s4096_s3 = sld [smem:[#allocation14_spill]] (!%p524_p9)  ;;  %s4097_s18 = sld [smem:[#allocation12_spill]] (!%p524_p9)  ;;  %vm2649_vm3 = vcmask (!%p524_p9), 523264  }
  0x1a   : > { %v3250_v32 = vpack.c.bf16 (!%p524_p9), %v922_v30, %v921_v29  ;;  %v923_v35 = vld [vmem:[%s4058_s4 + $0x30] sm:$0xff] (!%p524_p9)  ;;  %v924_v36 = vld [vmem:[%s4058_s4 + $0x38] sm:$0xff] (!%p524_p9)  ;;  %v3247_v37 = vpack.c.bf16 (!%p524_p9), %v920_v34, %v919_v33  ;;  %v925_v39 = vld [vmem:[%s4058_s4 + $0x40] sm:$0xff] (!%p524_p9)  ;;  %s4098_s20 = sld [smem:[#allocation15_spill]] (!%p524_p9) }
  0x1b   : > { %v3253_v38 = vpack.c.bf16 (!%p524_p9), %v924_v36, %v923_v35  ;;  %v926_v40 = vld [vmem:[%s4058_s4 + $0x48] sm:$0xff] (!%p524_p9)  ;;  %v929_v41 = vld [vmem:[%s4058_s4 + $0x60] sm:$0xff] (!%p524_p9)  ;;  %v927_v45 = vld [vmem:[%s4058_s4 + $0x50] sm:$0xff] (!%p524_p9) }
  0x1c   : > { %v930_v42 = vld [vmem:[%s4058_s4 + $0x68] sm:$0xff] (!%p524_p9)  ;;  %v3256_v43 = vpack.c.bf16 (!%p524_p9), %v926_v40, %v925_v39  ;;  %v928_v46 = vld [vmem:[%s4058_s4 + $0x58] sm:$0xff] (!%p524_p9)  ;;  %v931_v47 = vld [vmem:[%s4058_s4 + $0x70] sm:$0xff] (!%p524_p9) }
  0x1d   : > { %v589_v0 = vld [vmem:[%s4094_s26] sm:$0xff] (!%p524_p9)  ;;  %v590_v1 = vld [vmem:[%s4094_s26 + $0x8] sm:$0xff] (!%p524_p9)  ;;  %v591_v6 = vld [vmem:[%s4094_s26 + $0x10] sm:$0xff] (!%p524_p9)  ;;  %v3262_v44 = vpack.c.bf16 (!%p524_p9), %v930_v42, %v929_v41  ;;  %v3259_v49 = vpack.c.bf16 (!%p524_p9), %v928_v46, %v927_v45 }
  0x1e   : > { %v593_v2 = vld [vmem:[%s4094_s26 + $0x20] sm:$0xff] (!%p524_p9)  ;;  %v3220_v4 = vpack.c.bf16 (!%p524_p9), %v590_v1, %v589_v0  ;;  %v594_v5 = vld [vmem:[%s4094_s26 + $0x28] sm:$0xff] (!%p524_p9)  ;;  %v592_v7 = vld [vmem:[%s4094_s26 + $0x18] sm:$0xff] (!%p524_p9) }
  0x1f   : > { %v3226_v8 = vpack.c.bf16 %v594_v5, %v593_v2  ;;  %v595_v9 = vld [vmem:[%s4094_s26 + $0x30] sm:$0xff]  ;;  %v596_v10 = vld [vmem:[%s4094_s26 + $0x38] sm:$0xff]  ;;  %v3223_v12 = vpack.c.bf16 %v592_v7, %v591_v6  ;;  %s3614_s29 = scalar_select %p580_p10, %s3555_s0, 1  ;;  %v597_v14 = vld [vmem:[%s4094_s26 + $0x40] sm:$0xff] }
  0x20   : > { %3221 = vmatpush3.bf16.msra.mxu0 %v3220_v4  ;;  %v3229_v13 = vpack.c.bf16 %v596_v10, %v595_v9  ;;  %v598_v15 = vld [vmem:[%s4094_s26 + $0x48] sm:$0xff]  ;;  %v601_v16 = vld [vmem:[%s4094_s26 + $0x60] sm:$0xff]  ;;  %v599_v21 = vld [vmem:[%s4094_s26 + $0x50] sm:$0xff] }
  0x21   : > { %3227 = vmatpush3.bf16.msra.mxu1 %v3226_v8  ;;  %3222 = vmatprep.subr.bf16.mxu0 %v3435_v3  ;;  %s2844_s25 = sshll.u32 %s3614_s29, 3  ;;  %v602_v17 = vld [vmem:[%s4094_s26 + $0x68] sm:$0xff]  ;;  %v3232_v19 = vpack.c.bf16 %v598_v15, %v597_v14  ;;  %v600_v22 = vld [vmem:[%s4094_s26 + $0x58] sm:$0xff]  ;;  %v603_v23 = vld [vmem:[%s4094_s26 + $0x70] sm:$0xff] }
  0x22   : > { %3228 = vmatprep.subr.bf16.mxu1 %v3435_v3  ;;  %s583_s1 = scalar_lea.vmem %s4095_s27, %s2844_s25  ;;  %v3238_v20 = vpack.c.bf16 %v602_v17, %v601_v16  ;;  %v604_v24 = vld [vmem:[%s4094_s26 + $0x78] sm:$0xff]  ;;  %v3235_v25 = vpack.c.bf16 %v600_v22, %v599_v21  ;;  %v1241_v51 = vld [vmem:[%s4060_s6] sm:$0xff]  ;;  %v1242_v52 = vld [vmem:[%s4060_s6 + $0x8] sm:$0xff]  ;;  %s587_s30 = scalar_lea.vmem %s4097_s18, %s2844_s25 }
  0x23   : > { %v3636_v18 = vld [vmem:[%s583_s1] sm:$0xff]  ;;  %v3241_v26 = vpack.c.bf16 %v604_v24, %v603_v23  ;;  %v932_v48 = vld [vmem:[%s4058_s4 + $0x78] sm:$0xff]  ;;  %v3268_v53 = vpack.c.bf16 %v1242_v52, %v1241_v51  ;;  %v1243_v54 = vld [vmem:[%s4060_s6 + $0x10] sm:$0xff]  ;;  %s577_s18 = sand.u32 1, %s3425_s28   ;;  %s2896_s27 = sshll.u32 %s3555_s0, 7 }
  0x24   : > { %3224 = vmatpush3.bf16.msra.mxu0 %v3223_v12  ;;  %v3265_v50 = vpack.c.bf16 %v932_v48, %v931_v47  ;;  %v1244_v55 = vld [vmem:[%s4060_s6 + $0x18] sm:$0xff]  ;;  %v1245_v57 = vld [vmem:[%s4060_s6 + $0x20] sm:$0xff]  ;;  %v1246_v58 = vld [vmem:[%s4060_s6 + $0x28] sm:$0xff]  ;;  %s2755_s29 = scalar_lea.sflag [#allocation3], %s577_s18  ;;  %s3438_s0 = smov [#allocation2]  }
  0x25   : > { %3230 = vmatpush3.bf16.msra.mxu1 %v3229_v13  ;;  %3231 = vmatprep.subr.bf16.mxu0 %v3435_v3  ;;  %v3271_v56 = vpack.c.bf16 %v1244_v55, %v1243_v54  ;;  %v1249_v59 = vld [vmem:[%s4060_s6 + $0x40] sm:$0xff]  ;;  %v3274_v60 = vpack.c.bf16 %v1246_v58, %v1245_v57  ;;  %v1250_v61 = vld [vmem:[%s4060_s6 + $0x48] sm:$0xff]  ;;  %v1247_v63 = vld [vmem:[%s4060_s6 + $0x30] sm:$0xff] }
  0x26   : > { %3237 = vmatprep.subr.bf16.mxu1 %v3435_v3  ;;  %v3280_v62 = vpack.c.bf16 %v1250_v61, %v1249_v59  ;;  %v1248_v0 = vld [vmem:[%s4060_s6 + $0x38] sm:$0xff]  ;;  %v1251_v1 = vld [vmem:[%s4060_s6 + $0x50] sm:$0xff]  ;;  %v1253_v6 = vld [vmem:[%s4060_s6 + $0x60] sm:$0xff] }
  0x27   : > { %3006 = vmatmul.mubr.msk.f32.vlgmr.msra.gmra.mrb[0].mxu0 %vm633_vm1, %v3636_v18  ;;  %v3277_v2 = vpack.c.bf16 %v1248_v0, %v1247_v63  ;;  %v1252_v4 = vld [vmem:[%s4060_s6 + $0x58] sm:$0xff]  ;;  %v1254_v7 = vld [vmem:[%s4060_s6 + $0x68] sm:$0xff]  ;;  %v1255_v9 = vld [vmem:[%s4060_s6 + $0x70] sm:$0xff] }
  0x28   : > { %3017 = vmatmul.mubr.msk.f32.vlgmr.msra.gmra.mrb[0].mxu1 %vm633_vm1, %v3636_v18  ;;  %3233 = vmatpush3.bf16.msra.mxu0 %v3232_v19  ;;  %v3283_v5 = vpack.c.bf16 %v1252_v4, %v1251_v1  ;;  %v3286_v8 = vpack.c.bf16 %v1254_v7, %v1253_v6  ;;  %v1256_v10 = vld [vmem:[%s4060_s6 + $0x78] sm:$0xff]  ;;  %v2854_v22 = vld [vmem:[%s4059_s5] ss:$0 sm:$0xff]  ;;  %v2855_v24 = vld [vmem:[%s4059_s5 + $0x1] ss:$0 sm:$0xff] }
  0x29   : > { %3239 = vmatpush3.bf16.msra.mxu1 %v3238_v20  ;;  %3234 = vmatprep.subr.bf16.mxu0 %v3435_v3  ;;  %v3289_v12 = vpack.c.bf16 %v1256_v10, %v1255_v9  ;;  %v2856_v33 = vld [vmem:[%s4059_s5 + $0x2] ss:$0 sm:$0xff]  ;;  %v2857_v34 = vld [vmem:[%s4059_s5 + $0x3] ss:$0 sm:$0xff]  ;;  %v2862_v46 = vld [vmem:[%s4061_s7] ss:$0 sm:$0xff] }
  0x2a   : > { %3240 = vmatprep.subr.bf16.mxu1 %v3435_v3  ;;  %3027 = vmatprep.mubr.msk.f32.mxu0 %vm3436_vm0, %v3437_v11  ;;  %v2849_v41 = vld [vmem:[%s4096_s3 + $0x3] ss:$0 sm:$0xff] }
  0x2b   : > { %3038 = vmatprep.mubr.msk.f32.mxu1 %vm3436_vm0, %v3437_v11  ;;  %v1565_v58 = vld [vmem:[%s587_s30] sm:$0xff]  ;;  %s2843_s30 = sshll.u32 %s577_s18, 3 }
  0x2c   : > { %3236 = vmatpush3.bf16.msra.mxu0 %v3235_v25  ;;  %v2846_v25 = vld [vmem:[%s4096_s3] ss:$0 sm:$0xff]  ;;  %s579_s1 = scalar_lea.vmem [#allocation2], %s2843_s30  ;;  %s3375_s30 = sshll.u32 %s3438_s0, 4  ;;  %s3376_s30 = int_to_ptr.vmem [resolvable:$false] %s3375_s30 }
  0x2d   : > { %3242 = vmatpush3.bf16.msra.mxu1 %v3241_v26  ;;  %3243 = vmatprep.subr.bf16.mxu0 %v3435_v3  ;;  %s2768_s23 = sshll.u32 %s579_s1, 4  ;;  %s3377_s22 = scalar_lea.vmem %s3376_s30, 256  ;;  %s4013_s23 = int_to_ptr.vmem [resolvable:$true] %s2768_s23 }
  0x2e   : > { %3249 = vmatprep.subr.bf16.mxu1 %v3435_v3  ;;  %s3371_s25 = scalar_lea.vmem %s4013_s23, 128  ;;  %p3378_p0 = scmp.lt.s32.totalorder %s4013_s23, %s3376_s30 }
  0x2f   : > { %3028 = vmatmul.mubr.msk.f32.vlgmr.msra.gmra.mrb[2].mxu0 %vm633_vm1, %v3636_v18  ;;  %p3372_p11 = scmp.ne.s32.totalorder %s4013_s23, %s3371_s25  ;;  %p3379_p1 = scmp.lt.s32.totalorder %s3377_s22, %s3371_s25 }
  0x30   : > { %3039 = vmatmul.mubr.msk.f32.vlgmr.msra.gmra.mrb[2].mxu1 %vm633_vm1, %v3636_v18  ;;  %3245 = vmatpush3.bf16.msra.mxu0 %v3244_v31 }
  0x31   : > { %3251 = vmatpush3.bf16.msra.mxu1 %v3250_v32  ;;  %3246 = vmatprep.subr.bf16.mxu0 %v3435_v3  ;;  %v2847_v32 = vld [vmem:[%s4096_s3 + $0x1] ss:$0 sm:$0xff]  ;;  %p3373_p12 = pnand %p3372_p11, %p3572_p5  ;;  %p3380_p2 = por %p3379_p1, %p3378_p0 }
  0x32   : > { %3252 = vmatprep.subr.bf16.mxu1 %v3435_v3  ;;  %3049 = vmatprep.mubr.msk.f32.mxu0 %vm3436_vm0, %v3437_v11 }
  0x33   : > { %3060 = vmatprep.mubr.msk.f32.mxu1 %vm3436_vm0, %v3437_v11  ;;  %p3374_p13 = pneg %p3373_p12 }
  0x34   : > { %3248 = vmatpush3.bf16.msra.mxu0 %v3247_v37  ;;  %v2848_v37 = vld [vmem:[%s4096_s3 + $0x2] ss:$0 sm:$0xff]  ;;  %s4011_s3 = scalar_lea.hbm %s4098_s20, %s2896_s27 }
  0x35   : > { %3254 = vmatpush3.bf16.msra.mxu1 %v3253_v38  ;;  %3255 = vmatprep.subr.bf16.mxu0 %v3435_v3  ;;  %p3381_p3 = pnand %p3380_p2, %p3374_p13 }
  0x36   : > { %3261 = vmatprep.subr.bf16.mxu1 %v3435_v3 }
  0x37   : > { %3050 = vmatmul.mubr.msk.f32.vlgmr.msra.gmra.mrb[4].mxu0 %vm633_vm1, %v3636_v18 }
  0x38   : > { %3061 = vmatmul.mubr.msk.f32.vlgmr.msra.gmra.mrb[4].mxu1 %vm633_vm1, %v3636_v18  ;;  %3257 = vmatpush3.bf16.msra.mxu0 %v3256_v43 }
  0x39   : > { %3263 = vmatpush3.bf16.msra.mxu1 %v3262_v44  ;;  %3258 = vmatprep.subr.bf16.mxu0 %v3435_v3 }
  0x3a   : > { %3264 = vmatprep.subr.bf16.mxu1 %v3435_v3  ;;  %3071 = vmatprep.mubr.msk.f32.mxu0 %vm3436_vm0, %v3437_v11 }
  0x3b   : > { %3082 = vmatprep.mubr.msk.f32.mxu1 %vm3436_vm0, %v3437_v11 }
  0x3c   : > { %3260 = vmatpush3.bf16.msra.mxu0 %v3259_v49 }
  0x3d   : > { %3266 = vmatpush3.bf16.msra.mxu1 %v3265_v50  ;;  %3267 = vmatprep.subr.bf16.mxu0 %v3435_v3  ;;  %v2863_v50 = vld [vmem:[%s4061_s7 + $0x1] ss:$0 sm:$0xff] }
  0x3e   : > { %3273 = vmatprep.subr.bf16.mxu1 %v3435_v3 }
  0x3f   : > { %3072 = vmatmul.mubr.msk.f32.vlgmr.msra.gmra.mrb[6].mxu0 %vm633_vm1, %v3636_v18 }
  0x40   : > { %3083 = vmatmul.mubr.msk.f32.vlgmr.msra.gmra.mrb[6].mxu1 %vm633_vm1, %v3636_v18  ;;  %3269 = vmatpush3.bf16.msra.mxu0 %v3268_v53 }
  0x41   : > { %3270 = vmatprep.subr.bf16.mxu0 %v3435_v3  ;;  %3093 = vmatprep.mubr.msk.f32.mxu0 %vm3436_vm0, %v3437_v11 }
  0x42   : > { %3104 = vmatprep.mubr.msk.f32.mxu1 %vm3436_vm0, %v3437_v11  ;;  %3275 = vmatpush3.bf16.msra.mxu1 %v3274_v60 }
  0x43   : > { %3276 = vmatprep.subr.bf16.mxu1 %v3435_v3 }
  0x44   : > { %3272 = vmatpush3.bf16.msra.mxu0 %v3271_v56 }
  0x45   : > { %3279 = vmatprep.subr.bf16.mxu0 %v3435_v3 }
  0x46   : > { %3278 = vmatpush3.bf16.msra.mxu1 %v3277_v2 }
  0x47   : > { %3094 = vmatmul.mubr.msk.f32.vlgmr.msra.gmra.mrb[8].mxu0 %vm633_vm1, %v3636_v18  ;;  %3285 = vmatprep.subr.bf16.mxu1 %v3435_v3 }
  0x48   : > { %3281 = vmatpush3.bf16.msra.mxu0 %v3280_v62  ;;  %3115 = vmatprep.mubr.msk.f32.mxu0 %vm3436_vm0, %v3437_v11 }
  0x49   : > { %3282 = vmatprep.subr.bf16.mxu0 %v3435_v3  ;;  %3105 = vmatmul.mubr.msk.f32.vlgmr.msra.gmra.mrb[8].mxu1 %vm633_vm1, %v3636_v18 }
  0x4a   : > { %3287 = vmatpush3.bf16.msra.mxu1 %v3286_v8  ;;  %3126 = vmatprep.mubr.msk.f32.mxu1 %vm3436_vm0, %v3437_v11 }
  0x4b   : > { %3288 = vmatprep.subr.bf16.mxu1 %v3435_v3 }
  0x4c   : > { %3284 = vmatpush3.bf16.msra.mxu0 %v3283_v5 }
  0x4d   : > { %3129 = vmatprep.subr.mxu0 %v3437_v11 }
  0x4e   : > { %3290 = vmatpush3.bf16.msra.mxu1 %v3289_v12 }
  0x4f   : > { %3116 = vmatmul.mubr.msk.f32.vlgmr.msra.gmra.mrb[10].mxu0 %vm633_vm1, %v3636_v18  ;;  %3144 = vmatprep.subr.mxu1 %v3437_v11 }
  0x50   : > { %3131 = vmatprep.mubr.msk.f32.mxu0 %vm3436_vm0, %v3437_v11 }
  0x51   : > { %3127 = vmatmul.mubr.msk.f32.vlgmr.msra.gmra.mrb[10].mxu1 %vm633_vm1, %v3636_v18 }
  0x52   : > { %3146 = vmatprep.mubr.msk.f32.mxu1 %vm3436_vm0, %v3437_v11 }
  0xfa   : > { %v703_v13 = vpop.f32.mrb[0].mxu0 }
  0xfb   : > { %v3007_v14 = vpop.f32.mrb[1].mxu0  ;;  %v773_v15 = vpop.f32.mrb[0].mxu1  ;;  %v704_v31 = vadd.f32 %v2846_v25, %v703_v13 }
  0xfc   : > { %v3018_v16 = vpop.f32.mrb[1].mxu1  ;;  %v774_v35 = vadd.f32 %v2847_v32, %v773_v15 }
 0x102   : > { %v843_v17 = vpop.f32.mrb[2].mxu0 }
 0x103   : > { %v3029_v19 = vpop.f32.mrb[3].mxu0  ;;  %v913_v20 = vpop.f32.mrb[2].mxu1  ;;  %v844_v44 = vadd.f32 %v2848_v37, %v843_v17  ;;  %v2864_v37 = vld [vmem:[%s4061_s7 + $0x2] ss:$0 sm:$0xff] }
 0x104   : > { %v3040_v21 = vpop.f32.mrb[3].mxu1  ;;  %v914_v45 = vadd.f32 %v2849_v41, %v913_v20 }
 0x10a   : > { %v1027_v23 = vpop.f32.mrb[4].mxu0 }
 0x10b   : > { %v1028_v26 = vadd.f32 %v2854_v22, %v1027_v23  ;;  %v3051_v27 = vpop.f32.mrb[5].mxu0  ;;  %v1097_v28 = vpop.f32.mrb[4].mxu1 }
 0x10c   : > { %v3062_v29 = vpop.f32.mrb[5].mxu1  ;;  %v1098_v30 = vadd.f32 %v2855_v24, %v1097_v28 }
 0x10d   : > { %3130 = vmatpush3.xpose.msk.msra.mxu0 %vm1566_vm2, %v1028_v26 }
 0x10e   : > { %3134 = vmatprep.subr.mxu0 %v3437_v11 }
 0x110   : > { %3132 = vmatmul.mubr.msk.f32.vlgmr.msra.gmra.mrb[12].mxu0 %vm1566_vm2, %v704_v31 }
 0x111   : > { %3135 = vmatpush3.xpose.msk.msra.mxu0 %vm1566_vm2, %v1098_v30  ;;  %3136 = vmatprep.mubr.msk.f32.mxu0 %vm3436_vm0, %v3437_v11 }
 0x112   : > { %v1167_v36 = vpop.f32.mrb[6].mxu0  ;;  %3139 = vmatprep.subr.mxu0 %v3437_v11 }
 0x113   : > { %v1168_v38 = vadd.f32 %v2856_v33, %v1167_v36  ;;  %v1237_v39 = vpop.f32.mrb[6].mxu1  ;;  %v3073_v40 = vpop.f32.mrb[7].mxu0 }
 0x114   : > { %v1238_v42 = vadd.f32 %v2857_v34, %v1237_v39  ;;  %3137 = vmatmul.mubr.msk.f32.vlgmr.msra.gmra.mrb[14].mxu0 %vm1566_vm2, %v774_v35  ;;  %v3084_v43 = vpop.f32.mrb[7].mxu1 }
 0x115   : > { %3140 = vmatpush3.xpose.msk.msra.mxu0 %vm1566_vm2, %v1168_v38  ;;  %3141 = vmatprep.mubr.msk.f32.mxu0 %vm3436_vm0, %v3437_v11 }
 0x116   : > { %3145 = vmatpush3.xpose.msk.msra.mxu1 %vm1566_vm2, %v1238_v42  ;;  %3149 = vmatprep.subr.mxu0 %v3437_v11  ;;  %v2865_v42 = vld [vmem:[%s4061_s7 + $0x3] ss:$0 sm:$0xff] }
 0x117   : > { %3154 = vmatprep.subr.mxu1 %v3437_v11 }
 0x118   : > { %3142 = vmatmul.mubr.msk.f32.vlgmr.msra.gmra.mrb[16].mxu0 %vm1566_vm2, %v844_v44 }
 0x119   : > { %3147 = vmatmul.mubr.msk.f32.vlgmr.msra.gmra.mrb[12].mxu1 %vm1566_vm2, %v914_v45  ;;  %3151 = vmatprep.mubr.msk.f32.mxu0 %vm3436_vm0, %v3437_v11 }
 0x11a   : > { %3156 = vmatprep.mubr.msk.f32.mxu1 %vm3436_vm0, %v3437_v11  ;;  %v1351_v47 = vpop.f32.mrb[8].mxu0 }
 0x11b   : > { %v1352_v48 = vadd.f32 %v2862_v46, %v1351_v47  ;;  %v3095_v49 = vpop.f32.mrb[9].mxu0 }
 0x11c   : > { %v1421_v51 = vpop.f32.mrb[8].mxu1 }
 0x11d   : > { %3150 = vmatpush3.msra.mxu0 %v1352_v48  ;;  %v1422_v52 = vadd.f32 %v2863_v50, %v1421_v51  ;;  %v3106_v53 = vpop.f32.mrb[9].mxu1  ;;  %v2207_v50 = vld [vmem:[%s4062_s8] sm:$0xff]  ;;  %v2208_v51 = vld [vmem:[%s4062_s8 + $0x8] sm:$0xff] }
 0x11e   : > { %3159 = vmatprep.subr.mxu0 %v3437_v11 }
 0x11f   : > { %3155 = vmatpush3.msra.mxu1 %v1422_v52  ;;  %v2209_v52 = vld [vmem:[%s4062_s8 + $0x10] sm:$0xff] }
 0x120   : > { %3164 = vmatprep.subr.mxu1 %v3437_v11 }
 0x122   : > { %v3867_v54 = vpop.f32.mrb[10].mxu0 }
 0x123   : > { %v3117_v55 = vpop.f32.mrb[11].mxu0  ;;  %v1492_v41 = vadd.f32 %v2864_v37, %v3867_v54 }
 0x124   : > { %v3870_v56 = vpop.f32.mrb[10].mxu1  ;;  %v2210_v55 = vld [vmem:[%s4062_s8 + $0x18] sm:$0xff] }
 0x125   : > { %v3128_v57 = vpop.f32.mrb[11].mxu1  ;;  %v1562_v45 = vadd.f32 %v2865_v42, %v3870_v56  ;;  %v2887_v42 = vld [vmem:[%s4068_s14] ss:$0 sm:$0xff] }
 0x1e3   : > { %v1639_v59 = vpop.f32.mrb[12].mxu0 }
 0x1e4   : > { %v1640_v60 = vadd.f32 %v1639_v59, %v1565_v58  ;;  %v3133_v61 = vpop.f32.mrb[13].mxu0 }
 0x1e6   : > { %v1871_v62 = vsel %vm1566_vm2, %v1640_v60, -inf }
 0x1e7   : > { %1872 = vmax.xlane.f32.xlu0 %v1871_v62  ;;  %v1715_v63 = vpop.f32.mrb[14].mxu0 }
 0x1e8   : > { %v1716_v0 = vadd.f32 %v1715_v63, %v1565_v58  ;;  %v3138_v1 = vpop.f32.mrb[15].mxu0 }
 0x1ea   : > { %v1874_v2 = vsel %vm1566_vm2, %v1716_v0, -inf }
 0x1eb   : > { %1875 = vmax.xlane.f32.xlu0 %v1874_v2  ;;  %v1791_v4 = vpop.f32.mrb[16].mxu0 }
 0x1ec   : > { %v1867_v5 = vpop.f32.mrb[12].mxu1  ;;  %v1792_v6 = vadd.f32 %v1791_v4, %v1565_v58  ;;  %v3143_v7 = vpop.f32.mrb[17].mxu0 }
 0x1ed   : > { %v3148_v8 = vpop.f32.mrb[13].mxu1  ;;  %v1868_v9 = vadd.f32 %v1867_v5, %v1565_v58 }
 0x1ee   : > { %v1877_v10 = vsel %vm1566_vm2, %v1792_v6, -inf }
 0x1ef   : > { %1878 = vmax.xlane.f32.xlu1 %v1877_v10  ;;  %v1880_v12 = vsel %vm1566_vm2, %v1868_v9, -inf }
 0x1f3   : > { %1881 = vmax.xlane.f32.xlu1 %v1880_v12 }
 0x274   : > { %v1873_v13 = vpop.xlane.xlu0 %1872 }
 0x275   : > { %v1883_v14 = vsub.f32 %v1640_v60, %v1873_v13 }
 0x277   : > { %v1887_v15 = vmul.f32 1.442695, %v1883_v14 }
 0x278   : > { %v1876_v16 = vpop.xlane.xlu0 %1875 }
 0x279   : > { %3351 = vpow2.f32 %v1887_v15  ;;  %v1884_v17 = vsub.f32 %v1716_v0, %v1876_v16 }
 0x27b   : > { %v1889_v19 = vmul.f32 1.442695, %v1884_v17 }
 0x27c   : > { %v1879_v20 = vpop.xlane.xlu1 %1878 }
 0x27d   : > { %3353 = vpow2.f32 %v1889_v19  ;;  %v1885_v21 = vsub.f32 %v1792_v6, %v1879_v20 }
 0x27f   : > { %v1891_v22 = vmul.f32 1.442695, %v1885_v21 }
 0x280   : > { %v1882_v23 = vpop.xlane.xlu1 %1881 }
 0x281   : > { %3355 = vpow2.f32 %v1891_v22  ;;  %v1886_v24 = vsub.f32 %v1868_v9, %v1882_v23 }
 0x283   : > { %v3352_v25 = vpop.eup %3351  ;;  %v1893_v26 = vmul.f32 1.442695, %v1886_v24  ;;  %v2549_v24 = vld [vmem:[%s4064_s10] sm:$0xff] }
 0x284   : > { %v1895_v27 = vsel %vm1566_vm2, %v3352_v25, 0.0 }
 0x285   : > { %3357 = vpow2.f32 %v1893_v26  ;;  %1896 = vadd.xlane.f32.xlu0 %v1895_v27  ;;  %v2552_v27 = vld [vmem:[%s4064_s10 + $0x18] sm:$0xff] }
 0x287   : > { %v3354_v28 = vpop.eup %3353 }
 0x288   : > { %v1898_v29 = vsel %vm1566_vm2, %v3354_v28, 0.0 }
 0x289   : > { %1899 = vadd.xlane.f32.xlu1 %v1898_v29  ;;  %v2634_v29 = vld [vmem:[%s4066_s12] sm:$0xff] }
 0x28b   : > { %v3356_v30 = vpop.eup %3355 }
 0x28c   : > { %v1901_v31 = vsel %vm1566_vm2, %v3356_v30, 0.0 }
 0x28d   : > { %1902 = vadd.xlane.f32.xlu0 %v1901_v31  ;;  %v2636_v31 = vld [vmem:[%s4066_s12 + $0x10] sm:$0xff] }
 0x28f   : > { %v3358_v32 = vpop.eup %3357 }
 0x290   : > { %v1904_v33 = vsel %vm1566_vm2, %v3358_v32, 0.0 }
 0x291   : > { %1905 = vadd.xlane.f32.xlu1 %v1904_v33  ;;  %v2637_v33 = vld [vmem:[%s4066_s12 + $0x18] sm:$0xff] }
 0x312   : > { %v1897_v34 = vpop.xlane.xlu0 %1896 }
 0x313   : > { %3359 = vrcp.f32 %v1897_v34  ;;  %v3301_v34 = vpack.c.bf16 %v2637_v33, %v2636_v31 }
 0x316   : > { %v1900_v35 = vpop.xlane.xlu1 %1899 }
 0x317   : > { %3361 = vrcp.f32 %v1900_v35  ;;  %v2638_v35 = vld [vmem:[%s4066_s12 + $0x20] sm:$0xff] }
 0x31a   : > { %v1903_v36 = vpop.xlane.xlu0 %1902 }
 0x31b   : > { %3363 = vrcp.f32 %v1903_v36  ;;  %v2639_v36 = vld [vmem:[%s4066_s12 + $0x28] sm:$0xff] }
 0x31c   : > { %v3304_v37 = vpack.c.bf16 %v2639_v36, %v2638_v35 }
 0x31d   : > { %v3360_v38 = vpop.eup %3359 }
 0x31e   : > { %v1911_v39 = vmul.f32 %v3360_v38, %v3352_v25  ;;  %v1906_v40 = vpop.xlane.xlu1 %1905  ;;  %v2550_v25 = vld [vmem:[%s4064_s10 + $0x8] sm:$0xff] }
 0x31f   : > { %3365 = vrcp.f32 %v1906_v40  ;;  %v3292_v26 = vpack.c.bf16 %v2550_v25, %v2549_v24 }
 0x320   : > { %3152 = vmatmul.mubr.msk.f32.vlgmr.msra.gmra.mrb[18].mxu0 %vm1566_vm2, %v1911_v39 }
 0x321   : > { %v3362_v43 = vpop.eup %3361  ;;  %3160 = vmatpush3.msra.mxu0 %v1492_v41  ;;  %3161 = vmatprep.mubr.msk.f32.mxu0 %vm3436_vm0, %v3437_v11 }
 0x322   : > { %v1912_v44 = vmul.f32 %v3362_v43, %v3354_v28  ;;  %3169 = vmatprep.subr.mxu0 %v3437_v11 }
 0x324   : > { %3157 = vmatmul.mubr.msk.f32.vlgmr.msra.gmra.mrb[14].mxu1 %vm1566_vm2, %v1912_v44  ;;  %v2888_v44 = vld [vmem:[%s4069_s15] ss:$0 sm:$0xff] }
 0x325   : > { %v3364_v46 = vpop.eup %3363  ;;  %3165 = vmatpush3.msra.mxu1 %v1562_v45  ;;  %3166 = vmatprep.mubr.msk.f32.mxu1 %vm3436_vm0, %v3437_v11 }
 0x326   : > { %v1913_v47 = vmul.f32 %v3364_v46, %v3356_v30  ;;  %3174 = vmatprep.subr.mxu1 %v3437_v11  ;;  %v2635_v30 = vld [vmem:[%s4066_s12 + $0x8] sm:$0xff] }
 0x328   : > { %3162 = vmatmul.mubr.msk.f32.vlgmr.msra.gmra.mrb[20].mxu0 %vm1566_vm2, %v1913_v47  ;;  %v2641_v47 = vld [vmem:[%s4066_s12 + $0x38] sm:$0xff] }
 0x329   : > { %v3366_v48 = vpop.eup %3365  ;;  %3171 = vmatprep.mubr.msk.f32.mxu0 %vm3436_vm0, %v3437_v11  ;;  %3170 = vmatpush3.msra.mxu0 %v2207_v50 }
 0x32a   : > { %v1914_v49 = vmul.f32 %v3366_v48, %v3358_v32  ;;  %3179 = vmatprep.subr.mxu0 %v3437_v11  ;;  %v3298_v32 = vpack.c.bf16 %v2635_v30, %v2634_v29 }
 0x32c   : > { %3167 = vmatmul.mubr.msk.f32.vlgmr.msra.gmra.mrb[16].mxu1 %vm1566_vm2, %v1914_v49  ;;  %v2889_v49 = vld [vmem:[%s4065_s11] ss:$0 sm:$0xff] }
 0x32d   : > { %3176 = vmatprep.mubr.msk.f32.mxu1 %vm3436_vm0, %v3437_v11  ;;  %3175 = vmatpush3.msra.mxu1 %v2208_v51 }
 0x32e   : > { %3184 = vmatprep.subr.mxu1 %v3437_v11 }
 0x3f3   : > { %v1984_v53 = vpop.f32.mrb[18].mxu0 }
 0x3f4   : > { %v3153_v54 = vpop.f32.mrb[19].mxu0  ;;  %3172 = vmatmul.mubr.msk.f32.vlgmr.msra.gmra.mrb[22].mxu0 %vm1566_vm2, %v1984_v53 }
 0x3f5   : > { %3180 = vmatpush3.msra.mxu0 %v2209_v52  ;;  %3181 = vmatprep.mubr.msk.f32.mxu0 %vm3436_vm0, %v3437_v11  ;;  %v2891_v54 = vld [vmem:[%s4067_s13] ss:$0 sm:$0xff] }
 0x3f6   : > { %3291 = vmatprep.subr.bf16.mxu0 %v3435_v3 }
 0x3f7   : > { %v2057_v56 = vpop.f32.mrb[14].mxu1 }
 0x3f8   : > { %v3158_v57 = vpop.f32.mrb[15].mxu1  ;;  %3177 = vmatmul.mubr.msk.f32.vlgmr.msra.gmra.mrb[18].mxu1 %vm1566_vm2, %v2057_v56 }
 0x3f9   : > { %3185 = vmatpush3.msra.mxu1 %v2210_v55  ;;  %3186 = vmatprep.mubr.msk.f32.mxu1 %vm3436_vm0, %v3437_v11 }
 0x3fa   : > { %3297 = vmatprep.subr.bf16.mxu1 %v3435_v3 }
 0x3fb   : > { %v2130_v58 = vpop.f32.mrb[20].mxu0 }
 0x3fc   : > { %v3163_v59 = vpop.f32.mrb[21].mxu0  ;;  %3182 = vmatmul.mubr.msk.f32.vlgmr.msra.gmra.mrb[24].mxu0 %vm1566_vm2, %v2130_v58 }
 0x3fd   : > { %3197 = vmatprep.mubr.msk.f32.mxu0 %vm3436_vm0, %v3437_v11  ;;  %3293 = vmatpush3.bf16.msra.mxu0 %v3292_v26 }
 0x3fe   : > { %3294 = vmatprep.subr.bf16.mxu0 %v3435_v3 }
 0x3ff   : > { %v2203_v60 = vpop.f32.mrb[16].mxu1 }
 0x400   : > { %v3168_v61 = vpop.f32.mrb[17].mxu1  ;;  %3187 = vmatmul.mubr.msk.f32.vlgmr.msra.gmra.mrb[20].mxu1 %vm1566_vm2, %v2203_v60 }
 0x401   : > { %3216 = vmatprep.mubr.msk.f32.mxu1 %vm3436_vm0, %v3437_v11  ;;  %v2886_v11 = vld [vmem:[%s4063_s9] ss:$0 sm:$0xff]  ;;  %3299 = vmatpush3.bf16.msra.mxu1 %v3298_v32 }
 0x402   : > { %3300 = vmatprep.subr.bf16.mxu1 %v3435_v3 }
 0x405   : > { %3302 = vmatpush3.bf16.msra.mxu1 %v3301_v34 }
 0x406   : > { %3303 = vmatprep.subr.bf16.mxu1 %v3435_v3 }
 0x409   : > { %3305 = vmatpush3.bf16.msra.mxu1 %v3304_v37 }
 0x40a   : > { %3306 = vmatprep.subr.bf16.mxu1 %v3435_v3  ;;  %v2640_v3 = vld [vmem:[%s4066_s12 + $0x30] sm:$0xff] }
 0x40b   : > { %v3307_v48 = vpack.c.bf16 %v2641_v47, %v2640_v3 }
 0x40d   : > { %3308 = vmatpush3.bf16.msra.mxu1 %v3307_v48 }
 0x4c7   : > { %v2280_v62 = vpop.f32.mrb[22].mxu0 }
 0x4c8   : > { %v3173_v63 = vpop.f32.mrb[23].mxu0  ;;  %v2503_v1 = vsel %vm633_vm1, %v2280_v62, 0.0 }
 0x4cb   : > { %v2353_v0 = vpop.f32.mrb[18].mxu1 }
 0x4cc   : > { %v2504_v2 = vsel %vm633_vm1, %v2353_v0, 0.0  ;;  %v3178_v4 = vpop.f32.mrb[19].mxu1 }
 0x4cd   : > { %v2505_v5 = vadd.f32 %v2504_v2, %v2503_v1 }
 0x4cf   : > { %v2426_v6 = vpop.f32.mrb[24].mxu0 }
 0x4d0   : > { %v2506_v7 = vsel %vm633_vm1, %v2426_v6, 0.0  ;;  %v3183_v8 = vpop.f32.mrb[25].mxu0  ;;  %v2893_v6 = vld [vmem:[%s4070_s16] ss:$0 sm:$0xff] }
 0x4d1   : > { %v2507_v9 = vadd.f32 %v2506_v7, %v2505_v5  ;;  %v2894_v8 = vld [vmem:[%s4071_s17] ss:$0 sm:$0xff] }
 0x4d3   : > { %v2499_v10 = vpop.f32.mrb[20].mxu1 }
 0x4d4   : > { %v2508_v12 = vsel %vm633_vm1, %v2499_v10, 0.0  ;;  %v3188_v13 = vpop.f32.mrb[21].mxu1 }
 0x4d5   : > { %v2509_v14 = vadd.f32 %v2508_v12, %v2507_v9 }
 0x4d7   : > { %v2517_v15 = vadd.f32 %v2886_v11, %v2509_v14 }
 0x4d9   : > { %v2518_v16 = vadd.f32 %v2517_v15, %v3636_v18  ;;  %v2551_v18 = vld [vmem:[%s4064_s10 + $0x10] sm:$0xff] }
 0x4da   : > { %v3295_v28 = vpack.c.bf16 %v2552_v27, %v2551_v18 }
 0x4db   : > { %v2519_v17 = vsel %vm633_vm1, %v2518_v16, 0.0 }
 0x4dc   : > { %2520 = vadd.xlane.f32.xlu0 %v2519_v17  ;;  %3296 = vmatpush3.bf16.msra.mxu0 %v3295_v28 }
 0x569   : > { %v2521_v19 = vpop.xlane.xlu0 %2520 }
 0x56a   : > { %v2523_v20 = vmul.f32 0.03125, %v2521_v19 }
 0x56c   : > { %v2524_v21 = vsub.f32 %v2518_v16, %v2523_v20 }
 0x56e   : > { %v2525_v22 = vmul.f32 %v2524_v21, %v2524_v21 }
 0x570   : > { %v2526_v23 = vsel %vm633_vm1, %v2525_v22, 0.0 }
 0x571   : > { %2527 = vadd.xlane.f32.xlu1 %v2526_v23 }
 0x5fe   : > { %v2528_v38 = vpop.xlane.xlu1 %2527 }
 0x5ff   : > { %v2529_v39 = vmul.f32 0.03125, %v2528_v38 }
 0x601   : > { %v2530_v40 = vadd.f32 1e-05, %v2529_v39 }
 0x603   : > { %3367 = vrsqrt.f32 %v2530_v40 }
 0x60d   : > { %v3368_v41 = vpop.eup %3367 }
 0x60e   : > { %v2532_v43 = vmul.f32 %v3368_v41, %v2524_v21 }
 0x610   : > { %v2540_v45 = vmul.f32 %v2887_v42, %v2532_v43 }
 0x612   : > { %v2548_v46 = vadd.f32 %v2888_v44, %v2540_v45 }
 0x614   : > { %3198 = vmatmul.mubr.msk.f32.vlgmr.msra.gmra.mrb[26].mxu0 %vm633_vm1, %v2548_v46 }
 0x6e7   : > { %v2629_v50 = vpop.f32.mrb[26].mxu0 }
 0x6e8   : > { %v2630_v51 = vadd.f32 %v2889_v49, %v2629_v50  ;;  %v3199_v52 = vpop.f32.mrb[27].mxu0 }
 0x6ea   : > { %v2633_v53 = vmax.f32 %v2630_v51, 0.0 }
 0x6ec   : > { %3217 = vmatmul.mubr.msk.f32.vlgmr.msra.gmra.mrb[22].mxu1 %vm2649_vm3, %v2633_v53 }
 0x7bf   : > { %v2719_v55 = vpop.f32.mrb[22].mxu1 }
 0x7c0   : > { %v2720_v56 = vadd.f32 %v2891_v54, %v2719_v55  ;;  %v3218_v57 = vpop.f32.mrb[23].mxu1 }
 0x7c2   : > { %v2723_v58 = vadd.f32 %v2720_v56, %v2548_v46 }
 0x7c4   : > { %v2724_v59 = vsel %vm633_vm1, %v2723_v58, 0.0 }
 0x7c5   : > { %2725 = vadd.xlane.f32.xlu0 %v2724_v59 }
 0x852   : > { %v2726_v60 = vpop.xlane.xlu0 %2725 }
 0x853   : > { %v2727_v61 = vmul.f32 0.03125, %v2726_v60 }
 0x855   : > { %v2728_v62 = vsub.f32 %v2723_v58, %v2727_v61 }
 0x857   : > { %v2729_v63 = vmul.f32 %v2728_v62, %v2728_v62 }
 0x859   : > { %v2730_v0 = vsel %vm633_vm1, %v2729_v63, 0.0 }
 0x85a   : > { %2731 = vadd.xlane.f32.xlu1 %v2730_v0 }
 0x8e7   : > { %v2732_v1 = vpop.xlane.xlu1 %2731 }
 0x8e8   : > { %v2733_v2 = vmul.f32 0.03125, %v2732_v1 }
 0x8ea   : > { %v2734_v4 = vadd.f32 1e-05, %v2733_v2 }
 0x8ec   : > { %3369 = vrsqrt.f32 %v2734_v4 }
 0x8f6   : > { %v3370_v5 = vpop.eup %3369 }
 0x8f7   : > { %v2736_v7 = vmul.f32 %v3370_v5, %v2728_v62 }
 0x8f9   : > { %v2744_v9 = vmul.f32 %v2893_v6, %v2736_v7 }
 0x8fb   : > { %v2752_v10 = vadd.f32 %v2894_v8, %v2744_v9 }
 0x8fd   : > { %2753 = vst.msk [vmem:[%s579_s1] sm:$0xff] %vm633_vm1, %v2752_v10 }
 0x8fe   : > { %3384 = shalt.err (!%p3381_p3)
}
 0x8ff   : > { %s3385_s18 = scalar_lea.hbm %s4011_s3, 128  ;;  %s3389_s1 = scalar_lea.hbm %s4098_s20, 256 }
 0x900   : > { %p3386_p4 = scmp.ne.s32.totalorder %s4011_s3, %s3385_s18  ;;  %p3390_p9 = scmp.lt.u32.totalorder %s4011_s3, %s4098_s20 }
 0x901   : > { %p3391_p10 = scmp.lt.u32.totalorder %s3389_s1, %s3385_s18  ;;  %p3393_p12 = scmp.lt.u32.totalorder %s3385_s18, %s4011_s3 }
 0x902   : > { %p3387_p7 = pnand %p3386_p4, %p3572_p5 }
 0x903   : > { %p3392_p11 = por %p3391_p10, %p3390_p9 }
 0x904   : > { %p3388_p8 = pneg %p3387_p7 }
 0x905   : > { %p3394_p13 = por %p3393_p12, %p3392_p11 }
 0x907   : > { %p3395_p0 = pnand %p3394_p13, %p3388_p8 }
 0x909   : > { %3398 = shalt.err (!%p3395_p0)
}
 0x90a   : > { %3309 = dma.vmem_to_hbm [thread:$0]  (%p3572_p5), %s4013_s23, 128, %s4011_s3, %s2755_s29  }
 0x90b PF: > { %s4099_s25 = sld [smem:[#allocation7_spill]]  ;;  %s4100_s0 = sld [smem:[#allocation5_spill]] }
 0x911   : > { %p3315_p1 = scmp.ge.s32.totalorder %s4099_s25, 2  ;;  %s2780_s22 = sand.u32 1, %s4100_s0  }
 0x912   : > { %s2781_s21 = scalar_lea.sflag [#allocation3], %s2780_s22 }
 0x913   : > { %p3312_p2 = pnand %p3315_p1, %p3576_p6 }
 0x915   : > { %3416 = dma.done.wait (!%p3312_p2), %s2781_s21, 128  }
 0x916   : > { %3418 = vsyncadd (!%p3312_p2), %s2781_s21, 4294967168  ;;  %s4102_s30 = sld [smem:[#allocation8_spill]]  ;;  %s4103_s18 = sld [smem:[#allocation6_spill]] }
 0x917   : > { %s4104_s29 = sld [smem:[#allocation9_spill]]  ;;  %s4105_s27 = smov %s3425_s28 }
 0x91c   : > { %p28_p3 = scmp.ge.s32.totalorder %s4102_s30, 4   ;;  %s4106_s28 = smov %s4103_s18 }
 0x91e   :  { %30 = sbr.rel (!%p28_p3) target bundleno = 9 (0x9), region = 130 }
 0x925   :  { %2786 = vsyncpa [#allocation3], 1 }
 0x926   :  { %2788 = vsyncpa [#allocation3 + $0x1], 1 }

</bundles_post_ra>
